<compile_context>
chip_gen: v7x
topology: tpu7x:2x2x1
jax: 0.10.0
libtpu: 0.0.40
codegen_flags: <defaults>
</compile_context>

<pallas_src>
import functools

import jax
import jax.numpy as jnp
from jax.experimental import pallas as pl
from jax.experimental.pallas import tpu as pltpu


_LANES = 128
_BLOCK_ROWS = 4096            # (4096, 128) f32 block = 2 MiB; 2 arrays x 2 buffers = 8 MiB VMEM.
_PALLAS_MIN_ELEMENTS = 65536  # below this the pallas_call is ~100% fixed overhead -> plain XLA.


def _decay_kernel_const(w_ref, out_ref, *, neg_dt, tau_min, delta):
    # tau = tau_min + w * delta  ==  w*tau_max + (1-w)*tau_min ;  decay = exp(-dt / tau)
    w = w_ref[...]
    out_ref[...] = jnp.exp(neg_dt / (tau_min + w * delta))


def _decay_kernel_smem(scal_ref, w_ref, out_ref):
    # scal_ref: SMEM f32[3] = (neg_dt, tau_min, delta)
    neg_dt = scal_ref[0]
    tau_min = scal_ref[1]
    delta = scal_ref[2]
    w = w_ref[...]
    out_ref[...] = jnp.exp(neg_dt / (tau_min + w * delta))


def reference_forward(weight, dt, tau_min, tau_max):
    tau = weight * tau_max + (1.0 - weight) * tau_min
    return jnp.exp(-dt / tau)


def interpolation_trainer_forward(weight, dt, tau_min, tau_max, *, force_pallas=False):
    """exp(-dt / (w*tau_max + (1-w)*tau_min)) — Pallas TPU kernel for large w, XLA for tiny w.

    weight: f32[in_features]  ->  returns f32[in_features]
    """
    in_features = weight.shape[0]

    # Tiny sizes: one grid step (~0.35 us) + custom-call launch dominates; let XLA fuse it.
    if not force_pallas and in_features < _PALLAS_MIN_ELEMENTS:
        return reference_forward(weight.astype(jnp.float32), dt, tau_min, tau_max)

    # ---- lane-dense 2D slab: (total_rows, 128) with rows a multiple of 8 ----
    rows_needed = -(-in_features // _LANES)
    if rows_needed <= _BLOCK_ROWS:
        block_rows = max(8, ((rows_needed + 7) // 8) * 8)
        total_rows = block_rows
    else:
        block_rows = _BLOCK_ROWS
        total_rows = -(-rows_needed // _BLOCK_ROWS) * _BLOCK_ROWS
    n_blocks = total_rows // block_rows
    padded_len = total_rows * _LANES

    w_flat = weight.reshape(in_features).astype(jnp.float32)
    if padded_len > in_features:
        # pad with 1.0 -> tau = tau_max > 0 in dead lanes, keeps exp() finite; sliced off below.
        pad = jnp.ones((padded_len - in_features,), dtype=jnp.float32)
        w_flat = jnp.concatenate([w_flat, pad])
    w2d = w_flat.reshape(total_rows, _LANES)

    w_spec = pl.BlockSpec((block_rows, _LANES), lambda i: (i, 0))
    out_spec = pl.BlockSpec((block_rows, _LANES), lambda i: (i, 0))
    out_shape = jax.ShapeDtypeStruct((total_rows, _LANES), jnp.float32)
    compiler_params = pltpu.CompilerParams(
        # elementwise, fully independent blocks -> shard grid across both TCs on v7x.
        dimension_semantics=("parallel",),
    )

    static_scalars = all(isinstance(v, (int, float)) for v in (dt, tau_min, tau_max))
    if static_scalars:
        kernel = functools.partial(
            _decay_kernel_const,
            neg_dt=float(-dt),
            tau_min=float(tau_min),
            delta=float(tau_max - tau_min),
        )
        out = pl.pallas_call(
            kernel,
            out_shape=out_shape,
            grid=(n_blocks,),
            in_specs=[w_spec],
            out_specs=out_spec,
            compiler_params=compiler_params,
        )(w2d)
    else:
        dt_ = jnp.asarray(dt, jnp.float32)
        tmin_ = jnp.asarray(tau_min, jnp.float32)
        tmax_ = jnp.asarray(tau_max, jnp.float32)
        scalars = jnp.stack([-dt_, tmin_, tmax_ - tmin_])
        out = pl.pallas_call(
            _decay_kernel_smem,
            out_shape=out_shape,
            grid=(n_blocks,),
            in_specs=[pl.BlockSpec(memory_space=pltpu.SMEM), w_spec],
            out_specs=out_spec,
            compiler_params=compiler_params,
        )(scalars, w2d)

    return out.reshape(padded_len)[:in_features]


# TODO(synk): reset_parameters()/apply_parameter_constraints() are host-side parameter
# management (uniform init, clamp to [0,1]); not part of forward(), so not kernelized.


if __name__ == "__main__":
    dt, tau_min, tau_max = 1.0, 5.0, 25.0
    key = jax.random.PRNGKey(0)

    # Case 1: module-spec shape (in_features = 32), static Python-float scalars baked as
    # constants; force the Pallas path so the kernel is actually exercised.
    in_features = 32
    weight = jax.random.uniform(key, (in_features,), dtype=jnp.float32)
    decay = interpolation_trainer_forward(weight, dt, tau_min, tau_max, force_pallas=True)
    decay = jax.block_until_ready(decay)
    ref = reference_forward(weight, dt, tau_min, tau_max)
    assert decay.shape == (in_features,)
    assert jnp.allclose(decay, ref, atol=1e-6, rtol=1e-6), "const-scalar path mismatch"

    # Case 2: non-multiple-of-128 size with traced scalars -> SMEM-scalar kernel path.
    in2 = 300
    key2, _ = jax.random.split(key)
    weight2 = jax.random.uniform(key2, (in2,), dtype=jnp.float32)
    decay2 = interpolation_trainer_forward(
        weight2,
        jnp.float32(dt), jnp.float32(tau_min), jnp.float32(tau_max),
        force_pallas=True,
    )
    decay2 = jax.block_until_ready(decay2)
    ref2 = reference_forward(weight2, dt, tau_min, tau_max)
    assert decay2.shape == (in2,)
    assert jnp.allclose(decay2, ref2, atol=1e-6, rtol=1e-6), "SMEM-scalar path mismatch"

    # Case 3: tiny-size auto path (no Pallas launch; XLA fuses the elementwise expression).
    decay3 = interpolation_trainer_forward(weight, dt, tau_min, tau_max)
    decay3 = jax.block_until_ready(decay3)
    assert jnp.allclose(decay3, ref, atol=1e-6, rtol=1e-6), "XLA fast-path mismatch"

    print("KERNEL_OK")
</pallas_src>

<mosaic_0001>
module attributes {stable_mosaic.version = 11 : i64} {
  func.func @_decay_kernel_const(%arg0: i32, %arg1: memref<8x128xf32, #tpu.memory_space<vmem>>, %arg2: memref<8x128xf32, #tpu.memory_space<vmem>>) attributes {dimension_semantics = [#tpu.dimension_semantics<parallel>], iteration_bounds = array<i64: 1>, scalar_prefetch = 0 : i64, scratch_operands = 0 : i64, tpu.core_type = #tpu.core_type<tc>, window_params = [{transform_indices = @transform_0, window_bounds = array<i64: 8, 128>}, {transform_indices = @transform_1, window_bounds = array<i64: 8, 128>}]} {
    %c0 = arith.constant 0 : index
    %c0_0 = arith.constant 0 : index
    %0 = vector.load %arg1[%c0, %c0_0] : memref<8x128xf32, #tpu.memory_space<vmem>>, vector<8x128xf32>
    %cst = arith.constant 2.000000e+01 : f32
    %1 = vector.broadcast %cst : f32 to vector<8x128xf32>
    %2 = arith.mulf %0, %1 : vector<8x128xf32>
    %cst_1 = arith.constant 5.000000e+00 : f32
    %3 = vector.broadcast %cst_1 : f32 to vector<8x128xf32>
    %4 = arith.addf %3, %2 : vector<8x128xf32>
    %cst_2 = arith.constant -1.000000e+00 : f32
    %5 = vector.broadcast %cst_2 : f32 to vector<8x128xf32>
    %6 = arith.divf %5, %4 : vector<8x128xf32>
    %7 = math.exp %6 : vector<8x128xf32>
    %c0_3 = arith.constant 0 : index
    %c0_4 = arith.constant 0 : index
    %8 = vector.load %arg2[%c0_3, %c0_4] : memref<8x128xf32, #tpu.memory_space<vmem>>, vector<8x128xf32>
    tpu.vector_store %arg2[%c0_3, %c0_4], %7 {strides = array<i32>} : memref<8x128xf32, #tpu.memory_space<vmem>>, vector<8x128xf32>,
    return
  }
  func.func @transform_0(%arg0: i32) -> (i32, i32) {
    %c0_i32 = arith.constant 0 : i32
    %c0_i32_0 = arith.constant 0 : i32
    return %arg0, %c0_i32 : i32, i32
  }
  func.func @transform_1(%arg0: i32) -> (i32, i32) {
    %c0_i32 = arith.constant 0 : i32
    %c0_i32_0 = arith.constant 0 : i32
    return %arg0, %c0_i32 : i32, i32
  }
}

</mosaic_0001>

<bundles_post_ra>
// kernel: tpu_custom_call.1
= control target key start
LH: loop header
LB: loop body
LE: loop exit
PB: predicated region body
PF: predicated region fallthrough
CT: control target
= control target key end

     0   :  { %6 = vsyncpa [#allocation3], 0  ;;  %s134_s0 = inlined_call_operand.hbm [shape: f32[8,128], index: 0, kind: input, shape index: {}]   ;;  %s135_s1 = inlined_call_operand.hbm [shape: f32[8,128], index: 1, kind: output, shape index: {}]  }
   0x1   :  { %7 = vsyncpa [#allocation4], 0  ;;  %s98_s6 = smov [#allocation2]   ;;  %s50_s10 = scalar_lea.hbm %s134_s0, 128 }
   0x2   :  { %s14_s7 = sshll.u32 %s98_s6, 4  ;;  %p51_p0 = scmp.ne.s32.totalorder %s134_s0, %s50_s10  ;;  %s15_s7 = int_to_ptr.vmem [resolvable:$true] %s14_s7 }
   0x3   :  { %p54_p1 = scmp.lt.u32.totalorder %s50_s10, %s134_s0 }
   0x5   :  { %p56_p2 = pnand %p54_p1, %p51_p0 }
   0x7   :  { %59 = shalt.err (!%p56_p2)
}
   0x8   :  { %s60_s15 = scalar_lea.vmem %s15_s7, 128  ;;  %p65_p4 = scmp.lt.s32.totalorder %s15_s7, %s15_s7 }
   0x9   :  { %p61_p3 = scmp.ne.s32.totalorder %s15_s7, %s60_s15  ;;  %p66_p5 = scmp.lt.s32.totalorder %s60_s15, %s60_s15 }
   0xb   :  { %p67_p6 = por %p66_p5, %p65_p4 }
   0xd   :  { %p68_p7 = pnand %p67_p6, %p61_p3 }
   0xf   :  { %71 = shalt.err (!%p68_p7)
}
  0x10   :  { %17 = dma.hbm_to_vmem [thread:$0]  %s134_s0, 128, %s15_s7, [#allocation3]  }
  0x11   :  { %94 = dma.done.wait [#allocation3], 128  }
  0x12   :  { %95 = vsyncadd [#allocation3], 4294967168  ;;  %v21_v0 = vld [vmem:[#allocation2] sm:$0xff]  ;;  %s99_s18 = smov [#allocation5]  }
  0x13   :  { %v22_v1 = vmul.f32 20.0, %v21_v0  ;;  %s35_s19 = sshll.u32 %s99_s18, 4  ;;  %s36_s19 = int_to_ptr.vmem [resolvable:$true] %s35_s19 }
  0x14   :  { %s72_s20 = scalar_lea.vmem %s36_s19, 128  ;;  %p77_p9 = scmp.lt.s32.totalorder %s36_s19, %s36_s19 }
  0x15   :  { %v23_v2 = vadd.f32 5.0, %v22_v1  ;;  %p73_p8 = scmp.ne.s32.totalorder %s36_s19, %s72_s20  ;;  %p78_p10 = scmp.lt.s32.totalorder %s72_s20, %s72_s20 }
  0x17   :  { %46 = vrcp.f32 %v23_v2  ;;  %p79_p11 = por %p78_p10, %p77_p9 }
  0x19   :  { %p80_p12 = pnand %p79_p11, %p73_p8 }
  0x21   :  { %v47_v3 = vpop.eup %46 }
  0x22   :  { %v25_v4 = vmul.f32 -1.0, %v47_v3 }
  0x24   :  { %v26_v5 = vmul.f32 1.442695, %v25_v4 }
  0x26   :  { %48 = vpow2.f32 %v26_v5 }
  0x30   :  { %v49_v6 = vpop.eup %48 }
  0x31   :  { %28 = vst [vmem:[#allocation5] sm:$0xff] %v49_v6 }
  0x32   :  { %83 = shalt.err (!%p80_p12)
}
  0x33   :  { %s84_s22 = scalar_lea.hbm %s135_s1, 128 }
  0x34   :  { %p85_p13 = scmp.ne.s32.totalorder %s135_s1, %s84_s22  ;;  %p88_p0 = scmp.lt.u32.totalorder %s84_s22, %s135_s1 }
  0x36   :  { %p90_p1 = pnand %p88_p0, %p85_p13 }
  0x38   :  { %93 = shalt.err (!%p90_p1)
}
  0x39   :  { %38 = dma.vmem_to_hbm [thread:$0]  %s36_s19, 128, %s135_s1, [#allocation4]  }
  0x3a   :  { %96 = dma.done.wait [#allocation4], 128  }
  0x3b   :  { %97 = vsyncadd [#allocation4], 4294967168 }
  0x3c   :  { %42 = vsyncpa [#allocation3], 1 }
  0x3d   :  { %43 = vsyncpa [#allocation4], 1 }

</bundles_post_ra>
